<compile_context>
chip_gen: v6e
topology: v6e:2x2x1
jax: 0.10.0
libtpu: 0.0.40
codegen_flags: <defaults>
</compile_context>

<pallas_src>
import functools

import jax
import jax.numpy as jnp
from jax.experimental import pallas as pl
from jax.experimental.pallas import tpu as pltpu


def _round_up(x, m):
    return ((x + m - 1) // m) * m


def actor_kernel(x_ref,
                 w1_ref, b1_ref,
                 w2_ref, b2_ref,
                 w3_ref, b3_ref,
                 w4_ref, b4_ref,
                 out_ref):
    """Fused MLP on one batch tile: bf16 MXU matmuls, f32 elementwise chain."""
    def layer(h_f32, w_ref, b_ref):
        return jnp.dot(h_f32.astype(jnp.bfloat16), w_ref[...],
                       preferred_element_type=jnp.float32) + b_ref[...]

    h = jnp.maximum(layer(x_ref[...], w1_ref, b1_ref), 0.0)
    h = jnp.maximum(layer(h, w2_ref, b2_ref), 0.0)
    h = jnp.maximum(layer(h, w3_ref, b3_ref), 0.0)
    out_ref[...] = jnp.tanh(layer(h, w4_ref, b4_ref)).astype(out_ref.dtype)


@functools.partial(jax.jit, static_argnames=("block_b",))
def actor_forward(state, params, *, block_b=128):
    """state: [B, input_size] f32; params: dict of (w [in,out] f32, b [1,out] f32)."""
    w1, b1 = params["l1"]
    w2, b2 = params["l2"]
    w3, b3 = params["l3"]
    w4, b4 = params["l4"]

    B, in_size = state.shape
    hidden = w1.shape[1]
    out_size = w4.shape[1]

    # --- one-time-style prep (cheap; in a real rollout loop prepare once) ---
    # bf16 weights for the MXU; pad the action dim to a lane-dense multiple of 128.
    out_pad = _round_up(out_size, 128)
    w4p = jnp.zeros((hidden, out_pad), jnp.float32).at[:, :out_size].set(w4)
    b4p = jnp.zeros((1, out_pad), jnp.float32).at[:, :out_size].set(b4)
    w1b, w2b, w3b, w4b = (w.astype(jnp.bfloat16) for w in (w1, w2, w3, w4p))

    # --- batch tiling: pad B up to a multiple of the (sublane-aligned) tile ---
    tb = block_b if B >= block_b else _round_up(B, 8)
    b_pad = _round_up(B, tb)
    x = state if b_pad == B else (
        jnp.zeros((b_pad, in_size), state.dtype).at[:B].set(state))
    grid = (pl.cdiv(b_pad, tb),)

    def const_spec(a):
        return pl.BlockSpec(a.shape, lambda i: (0,) * a.ndim)

    # --- right-sized VMEM budget: weights + biases + double-buffered I/O tiles
    #     + working activations, with headroom; portable across v5e/v6e/v7x ---
    bf16, f32 = 2, 4
    w_bytes = (in_size * hidden + 2 * hidden * hidden + hidden * out_pad) * bf16
    b_bytes = (3 * hidden + out_pad) * f32
    io_bytes = 2 * 2 * (tb * in_size + tb * out_pad) * f32
    work_bytes = 4 * tb * max(hidden, out_pad) * f32
    vmem_limit = int(min(max(2 * (w_bytes + b_bytes + io_bytes + work_bytes)
                             + (8 << 20), 16 << 20), 32 << 20))

    out = pl.pallas_call(
        actor_kernel,
        out_shape=jax.ShapeDtypeStruct((b_pad, out_pad), jnp.float32),
        grid=grid,
        in_specs=[pl.BlockSpec((tb, in_size), lambda i: (i, 0)),
                  const_spec(w1b), const_spec(b1),
                  const_spec(w2b), const_spec(b2),
                  const_spec(w3b), const_spec(b3),
                  const_spec(w4b), const_spec(b4p)],
        out_specs=pl.BlockSpec((tb, out_pad), lambda i: (i, 0)),
        compiler_params=pltpu.CompilerParams(
            dimension_semantics=("parallel",),
            vmem_limit_bytes=vmem_limit),
    )(x, w1b, b1, w2b, b2, w3b, b3, w4b, b4p)

    return out[:B, :out_size]


def init_actor_params(key, input_size, hidden_size, output_size):
    """Mirror nn.Linear default init + the uniform(-0.003, 0.003) override on
    linear4 (weights stored as [in, out])."""
    ks = jax.random.split(key, 8)

    def linear_init(kw, kb, fan_in, fan_out, bound=None):
        if bound is None:
            bound = 1.0 / jnp.sqrt(fan_in)
        w = jax.random.uniform(kw, (fan_in, fan_out), jnp.float32, -bound, bound)
        b = jax.random.uniform(kb, (1, fan_out), jnp.float32, -bound, bound)
        return w, b

    return {
        "l1": linear_init(ks[0], ks[1], input_size, hidden_size),
        "l2": linear_init(ks[2], ks[3], hidden_size, hidden_size),
        "l3": linear_init(ks[4], ks[5], hidden_size, hidden_size),
        "l4": linear_init(ks[6], ks[7], hidden_size, output_size, bound=0.003),
    }


def actor_reference_f32(state, params):
    """Full-f32 reference (PyTorch semantics)."""
    w1, b1 = params["l1"]
    w2, b2 = params["l2"]
    w3, b3 = params["l3"]
    w4, b4 = params["l4"]
    h = jnp.maximum(state @ w1 + b1, 0.0)
    h = jnp.maximum(h @ w2 + b2, 0.0)
    h = jnp.maximum(h @ w3 + b3, 0.0)
    return jnp.tanh(h @ w4 + b4)


def actor_reference_bf16(state, params):
    """Reference using the kernel's arithmetic (bf16 matmul, f32 accumulate)."""
    def layer(h, wb):
        w, b = wb
        return jnp.dot(h.astype(jnp.bfloat16), w.astype(jnp.bfloat16),
                       preferred_element_type=jnp.float32) + b
    h = jnp.maximum(layer(state, params["l1"]), 0.0)
    h = jnp.maximum(layer(h, params["l2"]), 0.0)
    h = jnp.maximum(layer(h, params["l3"]), 0.0)
    return jnp.tanh(layer(h, params["l4"]))


if __name__ == "__main__":
    key = jax.random.PRNGKey(0)
    batch, input_size, hidden_size, output_size = 8, 16, 32, 8

    k_state, k_params = jax.random.split(key)
    state = jax.random.normal(k_state, (batch, input_size), jnp.float32)
    params = init_actor_params(k_params, input_size, hidden_size, output_size)

    out = actor_forward(state, params)
    jax.block_until_ready(out)

    assert out.shape == (batch, output_size)
    ref_bf16 = actor_reference_bf16(state, params)
    ref_f32 = actor_reference_f32(state, params)
    assert jnp.allclose(out, ref_bf16, atol=1e-4, rtol=1e-4), \
        "mismatch vs bf16-matmul reference"
    assert jnp.allclose(out, ref_f32, atol=2e-2, rtol=2e-2), \
        "mismatch vs f32 reference"

    print("KERNEL_OK")
</pallas_src>

<mosaic_0001>
module attributes {stable_mosaic.version = 11 : i64} {
  func.func @actor_kernel(%arg0: i32, %arg1: memref<8x16xf32, #tpu.memory_space<vmem>>, %arg2: memref<16x32xbf16, #tpu.memory_space<vmem>>, %arg3: memref<1x32xf32, #tpu.memory_space<vmem>>, %arg4: memref<32x32xbf16, #tpu.memory_space<vmem>>, %arg5: memref<1x32xf32, #tpu.memory_space<vmem>>, %arg6: memref<32x32xbf16, #tpu.memory_space<vmem>>, %arg7: memref<1x32xf32, #tpu.memory_space<vmem>>, %arg8: memref<32x128xbf16, #tpu.memory_space<vmem>>, %arg9: memref<1x128xf32, #tpu.memory_space<vmem>>, %arg10: memref<8x128xf32, #tpu.memory_space<vmem>>) attributes {dimension_semantics = [#tpu.dimension_semantics<parallel>], iteration_bounds = array<i64: 1>, scalar_prefetch = 0 : i64, scratch_operands = 0 : i64, tpu.core_type = #tpu.core_type<tc>, window_params = [{transform_indices = @transform_0, window_bounds = array<i64: 8, 16>}, {pipeline_mode = #tpu.pipeline_mode<synchronous>, transform_indices = @transform_1, window_bounds = array<i64: 16, 32>}, {pipeline_mode = #tpu.pipeline_mode<synchronous>, transform_indices = @transform_2, window_bounds = array<i64: 1, 32>}, {pipeline_mode = #tpu.pipeline_mode<synchronous>, transform_indices = @transform_3, window_bounds = array<i64: 32, 32>}, {pipeline_mode = #tpu.pipeline_mode<synchronous>, transform_indices = @transform_4, window_bounds = array<i64: 1, 32>}, {pipeline_mode = #tpu.pipeline_mode<synchronous>, transform_indices = @transform_5, window_bounds = array<i64: 32, 32>}, {pipeline_mode = #tpu.pipeline_mode<synchronous>, transform_indices = @transform_6, window_bounds = array<i64: 1, 32>}, {pipeline_mode = #tpu.pipeline_mode<synchronous>, transform_indices = @transform_7, window_bounds = array<i64: 32, 128>}, {pipeline_mode = #tpu.pipeline_mode<synchronous>, transform_indices = @transform_8, window_bounds = array<i64: 1, 128>}, {transform_indices = @transform_9, window_bounds = array<i64: 8, 128>}]} {
    %c0 = arith.constant 0 : index
    %c0_0 = arith.constant 0 : index
    %0 = vector.load %arg1[%c0, %c0_0] : memref<8x16xf32, #tpu.memory_space<vmem>>, vector<8x16xf32>
    %1 = arith.truncf %0 : vector<8x16xf32> to vector<8x16xbf16>
    %c0_1 = arith.constant 0 : index
    %c0_2 = arith.constant 0 : index
    %2 = vector.load %arg2[%c0_1, %c0_2] : memref<16x32xbf16, #tpu.memory_space<vmem>>, vector<16x32xbf16>
    %cst = arith.constant dense<0.000000e+00> : vector<8x32xf32>
    %3 = tpu.matmul %1, %2, %cst {dimension_numbers = #tpu.dot_dimension_numbers<[1], [0], [0], [1], [0, 0, 1, 1], [], []>} : vector<8x16xbf16>, vector<16x32xbf16>, vector<8x32xf32> -> vector<8x32xf32>
    %c0_3 = arith.constant 0 : index
    %c0_4 = arith.constant 0 : index
    %4 = vector.load %arg3[%c0_3, %c0_4] : memref<1x32xf32, #tpu.memory_space<vmem>>, vector<1x32xf32>
    %5 = vector.broadcast %4 : vector<1x32xf32> to vector<8x32xf32>
    %6 = arith.addf %3, %5 : vector<8x32xf32>
    %cst_5 = arith.constant 0.000000e+00 : f32
    %7 = vector.broadcast %cst_5 : f32 to vector<8x32xf32>
    %8 = arith.maximumf %6, %7 : vector<8x32xf32>
    %9 = arith.truncf %8 : vector<8x32xf32> to vector<8x32xbf16>
    %c0_6 = arith.constant 0 : index
    %c0_7 = arith.constant 0 : index
    %10 = vector.load %arg4[%c0_6, %c0_7] : memref<32x32xbf16, #tpu.memory_space<vmem>>, vector<32x32xbf16>
    %cst_8 = arith.constant dense<0.000000e+00> : vector<8x32xf32>
    %11 = tpu.matmul %9, %10, %cst_8 {dimension_numbers = #tpu.dot_dimension_numbers<[1], [0], [0], [1], [0, 0, 1, 1], [], []>} : vector<8x32xbf16>, vector<32x32xbf16>, vector<8x32xf32> -> vector<8x32xf32>
    %c0_9 = arith.constant 0 : index
    %c0_10 = arith.constant 0 : index
    %12 = vector.load %arg5[%c0_9, %c0_10] : memref<1x32xf32, #tpu.memory_space<vmem>>, vector<1x32xf32>
    %13 = vector.broadcast %12 : vector<1x32xf32> to vector<8x32xf32>
    %14 = arith.addf %11, %13 : vector<8x32xf32>
    %cst_11 = arith.constant 0.000000e+00 : f32
    %15 = vector.broadcast %cst_11 : f32 to vector<8x32xf32>
    %16 = arith.maximumf %14, %15 : vector<8x32xf32>
    %17 = arith.truncf %16 : vector<8x32xf32> to vector<8x32xbf16>
    %c0_12 = arith.constant 0 : index
    %c0_13 = arith.constant 0 : index
    %18 = vector.load %arg6[%c0_12, %c0_13] : memref<32x32xbf16, #tpu.memory_space<vmem>>, vector<32x32xbf16>
    %cst_14 = arith.constant dense<0.000000e+00> : vector<8x32xf32>
    %19 = tpu.matmul %17, %18, %cst_14 {dimension_numbers = #tpu.dot_dimension_numbers<[1], [0], [0], [1], [0, 0, 1, 1], [], []>} : vector<8x32xbf16>, vector<32x32xbf16>, vector<8x32xf32> -> vector<8x32xf32>
    %c0_15 = arith.constant 0 : index
    %c0_16 = arith.constant 0 : index
    %20 = vector.load %arg7[%c0_15, %c0_16] : memref<1x32xf32, #tpu.memory_space<vmem>>, vector<1x32xf32>
    %21 = vector.broadcast %20 : vector<1x32xf32> to vector<8x32xf32>
    %22 = arith.addf %19, %21 : vector<8x32xf32>
    %cst_17 = arith.constant 0.000000e+00 : f32
    %23 = vector.broadcast %cst_17 : f32 to vector<8x32xf32>
    %24 = arith.maximumf %22, %23 : vector<8x32xf32>
    %25 = arith.truncf %24 : vector<8x32xf32> to vector<8x32xbf16>
    %c0_18 = arith.constant 0 : index
    %c0_19 = arith.constant 0 : index
    %26 = vector.load %arg8[%c0_18, %c0_19] : memref<32x128xbf16, #tpu.memory_space<vmem>>, vector<32x128xbf16>
    %cst_20 = arith.constant dense<0.000000e+00> : vector<8x128xf32>
    %27 = tpu.matmul %25, %26, %cst_20 {dimension_numbers = #tpu.dot_dimension_numbers<[1], [0], [0], [1], [0, 0, 1, 1], [], []>} : vector<8x32xbf16>, vector<32x128xbf16>, vector<8x128xf32> -> vector<8x128xf32>
    %c0_21 = arith.constant 0 : index
    %c0_22 = arith.constant 0 : index
    %28 = vector.load %arg9[%c0_21, %c0_22] : memref<1x128xf32, #tpu.memory_space<vmem>>, vector<1x128xf32>
    %29 = vector.broadcast %28 : vector<1x128xf32> to vector<8x128xf32>
    %30 = arith.addf %27, %29 : vector<8x128xf32>
    %31 = math.tanh %30 : vector<8x128xf32>
    %c0_23 = arith.constant 0 : index
    %c0_24 = arith.constant 0 : index
    %32 = vector.load %arg10[%c0_23, %c0_24] : memref<8x128xf32, #tpu.memory_space<vmem>>, vector<8x128xf32>
    tpu.vector_store %arg10[%c0_23, %c0_24], %31 {strides = array<i32>} : memref<8x128xf32, #tpu.memory_space<vmem>>, vector<8x128xf32>,
    return
  }
  func.func @transform_0(%arg0: i32) -> (i32, i32) {
    %c0_i32 = arith.constant 0 : i32
    %c0_i32_0 = arith.constant 0 : i32
    return %arg0, %c0_i32 : i32, i32
  }
  func.func @transform_1(%arg0: i32) -> (i32, i32) {
    %c0_i32 = arith.constant 0 : i32
    %c0_i32_0 = arith.constant 0 : i32
    %c0_i32_1 = arith.constant 0 : i32
    return %c0_i32, %c0_i32_0 : i32, i32
  }
  func.func @transform_2(%arg0: i32) -> (i32, i32) {
    %c0_i32 = arith.constant 0 : i32
    %c0_i32_0 = arith.constant 0 : i32
    %c0_i32_1 = arith.constant 0 : i32
    return %c0_i32, %c0_i32_0 : i32, i32
  }
  func.func @transform_3(%arg0: i32) -> (i32, i32) {
    %c0_i32 = arith.constant 0 : i32
    %c0_i32_0 = arith.constant 0 : i32
    %c0_i32_1 = arith.constant 0 : i32
    return %c0_i32, %c0_i32_0 : i32, i32
  }
  func.func @transform_4(%arg0: i32) -> (i32, i32) {
    %c0_i32 = arith.constant 0 : i32
    %c0_i32_0 = arith.constant 0 : i32
    %c0_i32_1 = arith.constant 0 : i32
    return %c0_i32, %c0_i32_0 : i32, i32
  }
  func.func @transform_5(%arg0: i32) -> (i32, i32) {
    %c0_i32 = arith.constant 0 : i32
    %c0_i32_0 = arith.constant 0 : i32
    %c0_i32_1 = arith.constant 0 : i32
    return %c0_i32, %c0_i32_0 : i32, i32
  }
  func.func @transform_6(%arg0: i32) -> (i32, i32) {
    %c0_i32 = arith.constant 0 : i32
    %c0_i32_0 = arith.constant 0 : i32
    %c0_i32_1 = arith.constant 0 : i32
    return %c0_i32, %c0_i32_0 : i32, i32
  }
  func.func @transform_7(%arg0: i32) -> (i32, i32) {
    %c0_i32 = arith.constant 0 : i32
    %c0_i32_0 = arith.constant 0 : i32
    %c0_i32_1 = arith.constant 0 : i32
    return %c0_i32, %c0_i32_0 : i32, i32
  }
  func.func @transform_8(%arg0: i32) -> (i32, i32) {
    %c0_i32 = arith.constant 0 : i32
    %c0_i32_0 = arith.constant 0 : i32
    %c0_i32_1 = arith.constant 0 : i32
    return %c0_i32, %c0_i32_0 : i32, i32
  }
  func.func @transform_9(%arg0: i32) -> (i32, i32) {
    %c0_i32 = arith.constant 0 : i32
    %c0_i32_0 = arith.constant 0 : i32
    return %arg0, %c0_i32 : i32, i32
  }
}

</mosaic_0001>

<bundles_post_ra>
// kernel: actor_forward.1
= control target key start
LH: loop header
LB: loop body
LE: loop exit
PB: predicated region body
PF: predicated region fallthrough
CT: control target
= control target key end

     0   :  { %v406_v1 = vmov 0.0   ;;  %vm51_vm0 = vcmask 130048   ;;  %vm407_vm1 = vmmov 0   ;;  %s505_s0 = inlined_call_operand.vmem [shape: f32[8,16], index: 0, kind: input, shape index: {}]   ;;  %s506_s1 = inlined_call_operand.vmem [shape: bf16[16,32], index: 1, kind: input, shape index: {}]   ;;  %s507_s2 = inlined_call_operand.vmem [shape: f32[1,32], index: 2, kind: input, shape index: {}]   ;;  %s508_s3 = inlined_call_operand.vmem [shape: bf16[32,32], index: 3, kind: input, shape index: {}]   ;;  %s509_s4 = inlined_call_operand.vmem [shape: f32[1,32], index: 4, kind: input, shape index: {}]   ;;  %s510_s5 = inlined_call_operand.vmem [shape: bf16[32,32], index: 5, kind: input, shape index: {}]   ;;  %s511_s6 = inlined_call_operand.vmem [shape: f32[1,32], index: 6, kind: input, shape index: {}]   ;;  %s512_s7 = inlined_call_operand.vmem [shape: bf16[32,128], index: 7, kind: input, shape index: {}]   ;;  %s513_s8 = inlined_call_operand.vmem [shape: f32[1,128], index: 8, kind: input, shape index: {}]   ;;  %s514_s9 = inlined_call_operand.hbm [shape: f32[8,128], index: 9, kind: output, shape index: {}]  }
   0x1   :  { %v375_v0 = vld [vmem:[%s506_s1] sm:$0xff]   ;;  %342 = vmatprep.subr.bf16.mxu0 %v406_v1  ;;  %348 = vmatprep.subr.bf16.mxu1 %v406_v1 }
   0x2   :  { %v34_v2 = vld [vmem:[%s505_s0] sm:$0xff]  ;;  %343 = vmatpush3.bf16.msra.mxu0 %v375_v0  ;;  %344 = vmatprep.mubr.msk.bf16.mxu0 %vm407_vm1, %v406_v1 }
   0x3   :  { %v35_v3 = vpack.c.bf16 %v34_v2, %v34_v2  ;;  %352 = vmatprep.mubr.msk.bf16.mxu1 %vm407_vm1, %v406_v1  ;;  %356 = vmatprep.subr.bf16.mxu0 %v406_v1 }
   0x5   :  { %345 = vmatmul.mubr.msk.bf16.vlgmr.msra.gmra.mxu0 %vm51_vm0, %v35_v3 }
   0x6   :  { %360 = vmatprep.mubr.msk.bf16.mxu0 %vm407_vm1, %v406_v1 }
   0x7   :  { %14 = vsyncpa [#allocation3], 0  ;;  %v376_v4 = vld [vmem:[%s508_s3 + $0x8] sm:$0xff]   ;;  %v377_v5 = vld [vmem:[%s508_s3] sm:$0xff]   ;;  %vm120_vm2 = vcmask 261120  }
   0x8   :  { %349 = vmatpush3.bf16.msra.mxu1 %v376_v4  ;;  %v378_v6 = vld [vmem:[%s510_s5 + $0x8] sm:$0xff]   ;;  %v316_v7 = vld [vmem:[%s507_s2] ss:$0 sm:$0xff] }
   0x9   :  { %350 = vmatprep.subr.bf16.mxu1 %v406_v1  ;;  %357 = vmatpush3.bf16.msra.mxu0 %v378_v6  ;;  %v379_v15 = vld [vmem:[%s510_s5] sm:$0xff]   ;;  %v380_v16 = vld [vmem:[%s512_s7 + $0x8] sm:$0xff]  }
   0xa   :  { %358 = vmatprep.subr.bf16.mxu0 %v406_v1  ;;  %v319_v17 = vld [vmem:[%s509_s4] ss:$0 sm:$0xff] }
   0xb   :  { %v381_v25 = vld [vmem:[%s512_s7] sm:$0xff]  }
   0xc   :  { %351 = vmatpush3.bf16.msra.mxu1 %v377_v5  ;;  %v323_v26 = vld [vmem:[%s511_s6] ss:$0 sm:$0xff]  ;;  %s408_s6 = smov [#allocation2]  }
   0xd   :  { %364 = vmatprep.subr.bf16.mxu1 %v406_v1  ;;  %359 = vmatpush3.bf16.msra.mxu0 %v379_v15  ;;  %v327_v34 = vld [vmem:[%s513_s8] ss:$0 sm:$0xff]  ;;  %s308_s7 = sshll.u32 %s408_s6, 4  ;;  %s309_s7 = int_to_ptr.vmem [resolvable:$true] %s308_s7 }
   0xe   :  { %s384_s27 = scalar_lea.vmem %s309_s7, 128  ;;  %p389_p1 = scmp.lt.s32.totalorder %s309_s7, %s309_s7 }
   0xf   :  { %p385_p0 = scmp.ne.s32.totalorder %s309_s7, %s384_s27  ;;  %p390_p2 = scmp.lt.s32.totalorder %s384_s27, %s384_s27 }
  0x11   :  { %p391_p3 = por %p390_p2, %p389_p1 }
  0x13   :  { %p392_p4 = pnand %p391_p3, %p385_p0 }
  0xc5   :  { %v89_v8 = vpop.f32.mrf.mxu0 }
  0xc6   :  { %v90_v9 = vadd.f32 %v316_v7, %v89_v8 }
  0xc7   :  { %v346_v10 = vpop.f32.mrf.mxu0 }
  0xc8   :  { %v95_v11 = vmax.f32 %v90_v9, 0.0 }
  0xc9   :  { %v92_v12 = vpop.f32.mrf.mxu0 }
  0xca   :  { %v96_v13 = vpack.c.bf16 %v95_v11, %v95_v11 }
  0xcb   :  { %v347_v14 = vpop.f32.mrf.mxu0 }
  0xcc   :  { %353 = vmatmul.mubr.msk.bf16.vlgmr.msra.gmra.mxu1 %vm120_vm2, %v96_v13 }
  0xcd   :  { %368 = vmatprep.mubr.msk.bf16.mxu1 %vm407_vm1, %v406_v1  ;;  %365 = vmatpush3.bf16.msra.mxu1 %v380_v16 }
  0xce   :  { %366 = vmatprep.subr.bf16.mxu1 %v406_v1 }
  0xd1   :  { %367 = vmatpush3.bf16.msra.mxu1 %v381_v25 }
 0x18c   :  { %v158_v18 = vpop.f32.mrf.mxu1 }
 0x18d   :  { %v159_v19 = vadd.f32 %v319_v17, %v158_v18 }
 0x18e   :  { %v354_v20 = vpop.f32.mrf.mxu1 }
 0x18f   :  { %v164_v21 = vmax.f32 %v159_v19, 0.0 }
 0x190   :  { %v161_v22 = vpop.f32.mrf.mxu1 }
 0x191   :  { %v165_v23 = vpack.c.bf16 %v164_v21, %v164_v21 }
 0x192   :  { %v355_v24 = vpop.f32.mrf.mxu1 }
 0x193   :  { %361 = vmatmul.mubr.msk.bf16.vlgmr.msra.gmra.mxu0 %vm120_vm2, %v165_v23 }
 0x253   :  { %v226_v27 = vpop.f32.mrf.mxu0 }
 0x254   :  { %v227_v28 = vadd.f32 %v323_v26, %v226_v27 }
 0x255   :  { %v362_v29 = vpop.f32.mrf.mxu0 }
 0x256   :  { %v232_v30 = vmax.f32 %v227_v28, 0.0 }
 0x257   :  { %v229_v31 = vpop.f32.mrf.mxu0 }
 0x258   :  { %v233_v32 = vpack.c.bf16 %v232_v30, %v232_v30 }
 0x259   :  { %v363_v33 = vpop.f32.mrf.mxu0 }
 0x25a   :  { %369 = vmatmul.mubr.msk.bf16.vlgmr.msra.gmra.mxu1 %vm120_vm2, %v233_v32 }
 0x31a   :  { %v294_v35 = vpop.f32.mrf.mxu1 }
 0x31b   :  { %v295_v36 = vadd.f32 %v327_v34, %v294_v35 }
 0x31c   :  { %v370_v37 = vpop.f32.mrf.mxu1 }
 0x31d   :  { %382 = vtanh.f32 %v295_v36 }
 0x31e   :  { %v297_v38 = vpop.f32.mrf.mxu1 }
 0x320   :  { %v371_v39 = vpop.f32.mrf.mxu1 }
 0x32a   :  { %v383_v40 = vpop.eup %382 }
 0x32b   :  { %301 = vst [vmem:[#allocation2] sm:$0xff] %v383_v40 }
 0x32c   :  { %395 = shalt.err (!%p392_p4)
}
 0x32d   :  { %311 = dma.vmem_to_hbm [thread:$0]  %s309_s7, 128, %s514_s9, [#allocation3]  }
 0x32e   :  { %404 = dma.done.wait [#allocation3], 128  }
 0x32f   :  { %405 = vsyncadd [#allocation3], 4294967168 }
 0x330   :  { %315 = vsyncpa [#allocation3], 1 }

</bundles_post_ra>
